<compile_context>
chip_gen: v7x
topology: tpu7x:2x2x1
jax: 0.10.0
libtpu: 0.0.40
codegen_flags: <defaults>
</compile_context>

<pallas_src>
import math
import functools

import jax
import jax.numpy as jnp
from jax.experimental import pallas as pl
from jax.experimental.pallas import tpu as pltpu

_EPS = 1e-5


# --------------------------------------------------------------------------- #
# small helpers
# --------------------------------------------------------------------------- #

def _vmem_limit_bytes():
    """Per-generation scoped-VMEM budget: ~85% of physical, capped at 110 MiB."""
    try:
        cap = int(pltpu.get_tpu_info().vmem_capacity_bytes)
    except Exception:
        cap = 64 * 1024 * 1024                      # conservative fallback
    return max(32 * 1024 * 1024, min(int(cap * 0.85), 110 * 1024 * 1024))


# Probe once for pipeline_mode=pl.Buffered(1) support (kills the 2x resident-
# weight VMEM from default double buffering).  Falls back to a plain spec.
try:
    pl.BlockSpec((8, 128), lambda i: (0, 0), pipeline_mode=pl.Buffered(1))
    _BUFFERED_OK = True
except Exception:
    _BUFFERED_OK = False


def _resident_spec(block_shape, index_map):
    """Constant-index (VMEM-resident) weight spec, single-buffered when supported."""
    if _BUFFERED_OK:
        return pl.BlockSpec(block_shape, index_map, pipeline_mode=pl.Buffered(1))
    return pl.BlockSpec(block_shape, index_map)


def _row_tile(n_rows, cap=512):
    """Row tile for (B*T)-tiled kernels: large (<=cap), 8-aligned; caller pads."""
    return min(cap, ((n_rows + 7) // 8) * 8)


def _divisor_tile(n, cap):
    """Largest multiple of 8 that divides n and is <= cap (n must be 8-aligned)."""
    best = 8
    for t in range(8, min(cap, n) + 1, 8):
        if n % t == 0:
            best = t
    return best


def _pad_rows(x2d, padded_rows):
    n = x2d.shape[0]
    if padded_rows == n:
        return x2d
    return jnp.pad(x2d, ((0, padded_rows - n), (0, 0)))


def _new_gelu(x):
    c = math.sqrt(2.0 / math.pi)
    return 0.5 * x * (1.0 + jnp.tanh(c * (x + 0.044715 * x * x * x)))


# --------------------------------------------------------------------------- #
# kernel 0: BatchNorm statistics (per-tile partials, fully parallel grid)
# --------------------------------------------------------------------------- #

def _bn_partial_kernel(x_ref, stat_ref):
    xb = x_ref[...]                                        # (tile, C) f32
    stat_ref[0, 0:1] = jnp.sum(xb, axis=0, keepdims=True)
    stat_ref[0, 1:2] = jnp.sum(xb * xb, axis=0, keepdims=True)


def _finish_stats(stats, n_rows, gamma, beta, eps):
    # NOTE: single-pass E[x^2] - E[x]^2 in f32 (fine for typical activations).
    inv_n = 1.0 / n_rows
    mean = stats[0:1] * inv_n                              # (1, C)
    var = stats[1:2] * inv_n - mean * mean                 # biased (training-mode)
    rstd = jax.lax.rsqrt(var + eps)
    scale = rstd * gamma
    shift = beta - mean * scale
    return scale, shift


def _bn_scale_shift(x2d, gamma, beta, *, eps, vmem_limit):
    """Training-mode BatchNorm1d stats over all rows -> fused (scale, shift)."""
    n_rows, C = x2d.shape
    tile = _row_tile(n_rows)
    padded = pl.cdiv(n_rows, tile) * tile
    xp = _pad_rows(x2d, padded)                            # zero rows: harmless for sums
    ntiles = padded // tile
    partial = pl.pallas_call(
        _bn_partial_kernel,
        out_shape=jax.ShapeDtypeStruct((ntiles, 2, C), jnp.float32),
        grid_spec=pltpu.PrefetchScalarGridSpec(
            num_scalar_prefetch=0,
            grid=(ntiles,),
            in_specs=[pl.BlockSpec((tile, C), lambda i: (i, 0))],
            out_specs=pl.BlockSpec((1, 2, C), lambda i: (i, 0, 0))),
        compiler_params=pltpu.CompilerParams(
            dimension_semantics=("parallel",),             # both TCs stream rows
            vmem_limit_bytes=vmem_limit),
    )(xp)
    return _finish_stats(jnp.sum(partial, axis=0), n_rows, gamma, beta, eps)


# --------------------------------------------------------------------------- #
# kernel 1: fused BN-apply + QKV projection, emitting head-major q/k/v
# --------------------------------------------------------------------------- #

def _qkv_kernel(x_ref, scale_ref, shift_ref, w_ref, b_ref, q_ref, k_ref, v_ref,
                *, n_head, head_dim, n_embd):
    xn = x_ref[0] * scale_ref[...] + shift_ref[...]        # (TT, C) f32, BN folded
    qkv = jnp.dot(xn.astype(jnp.bfloat16), w_ref[...],
                  preferred_element_type=jnp.float32) + b_ref[...]
    qkv = qkv.astype(jnp.bfloat16)                         # (TT, 3C)
    # Emit head-major layout with static per-head slice stores (no transpose op,
    # no HBM round-trip / wrapper-side transposes).
    for h in range(n_head):
        lo = h * head_dim
        q_ref[0, h] = qkv[:, lo:lo + head_dim]
        k_ref[0, h] = qkv[:, n_embd + lo:n_embd + lo + head_dim]
        v_ref[0, h] = qkv[:, 2 * n_embd + lo:2 * n_embd + lo + head_dim]


def _qkv_proj(x3d, scale, shift, wqkv, bqkv, n_head, *, vmem_limit):
    B, T, C = x3d.shape
    hd = C // n_head
    tt = _divisor_tile(T, 256)
    nt = T // tt
    kern = functools.partial(_qkv_kernel, n_head=n_head, head_dim=hd, n_embd=C)
    qkv_shape = jax.ShapeDtypeStruct((B, n_head, T, hd), jnp.bfloat16)
    # TODO(synk): for very large C, add an N-tile grid axis for wqkv instead of
    # keeping the full (C, 3C) slab resident.
    return pl.pallas_call(
        kern,
        out_shape=(qkv_shape, qkv_shape, qkv_shape),
        grid_spec=pltpu.PrefetchScalarGridSpec(
            num_scalar_prefetch=0,
            grid=(B, nt),
            in_specs=[
                pl.BlockSpec((1, tt, C), lambda b, t: (b, t, 0)),
                pl.BlockSpec((1, C), lambda b, t: (0, 0)),
                pl.BlockSpec((1, C), lambda b, t: (0, 0)),
                _resident_spec((C, 3 * C), lambda b, t: (0, 0)),
                pl.BlockSpec((1, 3 * C), lambda b, t: (0, 0)),
            ],
            out_specs=(
                pl.BlockSpec((1, n_head, tt, hd), lambda b, t: (b, 0, t, 0)),
                pl.BlockSpec((1, n_head, tt, hd), lambda b, t: (b, 0, t, 0)),
                pl.BlockSpec((1, n_head, tt, hd), lambda b, t: (b, 0, t, 0)),
            )),
        compiler_params=pltpu.CompilerParams(
            dimension_semantics=("parallel", "parallel"),
            vmem_limit_bytes=vmem_limit),
    )(x3d, scale, shift, wqkv, bqkv)


# --------------------------------------------------------------------------- #
# kernel 2: flash attention + out-projection + residual + BN2 partial stats
# --------------------------------------------------------------------------- #

def _attn_kernel(q_ref, k_ref, v_ref, xres_ref, wp_ref, bp_ref,
                 o_ref, stat_ref, m_sc, l_sc, acc_sc, y_sc,
                 *, scale, n_head, head_dim, tq, tk):
    qi = pl.program_id(1)
    kv = pl.program_id(2)

    @pl.when(kv == 0)
    def _():
        m_sc[...] = jnp.full_like(m_sc, -1e30)
        l_sc[...] = jnp.zeros_like(l_sc)
        acc_sc[...] = jnp.zeros_like(acc_sc)

    # Skip kv tiles that lie entirely above the causal diagonal.
    @pl.when(kv * tk < (qi + 1) * tq)
    def _():
        q = q_ref[0]                                       # (H, TQ, hd) bf16
        k = k_ref[0]                                       # (H, TK, hd) bf16
        v = v_ref[0]
        s = jnp.einsum('htd,hsd->hts', q, k,
                       preferred_element_type=jnp.float32) * scale  # (H,TQ,TK) f32
        # Causal additive bias built in-register (no resident (T, T) mask).
        t_idx = qi * tq + jax.lax.broadcasted_iota(jnp.int32, (tq, tk), 0)
        s_idx = kv * tk + jax.lax.broadcasted_iota(jnp.int32, (tq, tk), 1)
        s = s + jnp.where(t_idx >= s_idx, 0.0, -1e30)
        m_prev = m_sc[...]                                 # (H, TQ, 1)
        m_new = jnp.maximum(m_prev, jnp.max(s, axis=-1, keepdims=True))
        alpha = jnp.exp(m_prev - m_new)
        p = jnp.exp(s - m_new)                             # f32 softmax math
        l_sc[...] = alpha * l_sc[...] + jnp.sum(p, axis=-1, keepdims=True)
        acc_sc[...] = alpha * acc_sc[...] + jnp.einsum(
            'hts,hsd->htd', p.astype(jnp.bfloat16), v,
            preferred_element_type=jnp.float32)
        m_sc[...] = m_new

    @pl.when(kv == pl.num_programs(2) - 1)
    def _():
        inv_l = pl.reciprocal(l_sc[...], approx=True)      # EUP slot
        y = (acc_sc[...] * inv_l).astype(jnp.bfloat16)     # (H, TQ, hd)
        # Assemble head-concat (TQ, C) layout with static slice stores so the
        # out-projection is a single full-depth matmul (no (H, TQ, C)
        # intermediate, no cross-sublane head reduction).
        for h in range(n_head):
            y_sc[:, h * head_dim:(h + 1) * head_dim] = y[h]
        proj = jnp.dot(y_sc[...], wp_ref[...],
                       preferred_element_type=jnp.float32)  # (TQ, C)
        x1 = xres_ref[...] + proj + bp_ref[...]             # residual
        o_ref[...] = x1
        # BN2 partial statistics -> avoids re-reading x1 from HBM later.
        stat_ref[0, 0:1] = jnp.sum(x1, axis=0, keepdims=True)
        stat_ref[0, 1:2] = jnp.sum(x1 * x1, axis=0, keepdims=True)


def _attention(q, k, v, x2d, wp, bp, *, vmem_limit):
    B, H, T, hd = q.shape
    n_rows, C = x2d.shape
    tq = _divisor_tile(T, 256)
    tk = _divisor_tile(T, 256)
    nq, nkv = T // tq, T // tk
    kern = functools.partial(_attn_kernel, scale=1.0 / math.sqrt(hd),
                             n_head=H, head_dim=hd, tq=tq, tk=tk)
    return pl.pallas_call(
        kern,
        out_shape=(jax.ShapeDtypeStruct((n_rows, C), jnp.float32),
                   jax.ShapeDtypeStruct((B * nq, 2, C), jnp.float32)),
        grid_spec=pltpu.PrefetchScalarGridSpec(
            num_scalar_prefetch=0,
            grid=(B, nq, nkv),
            in_specs=[
                pl.BlockSpec((1, H, tq, hd), lambda b, i, j: (b, 0, i, 0)),
                pl.BlockSpec((1, H, tk, hd), lambda b, i, j: (b, 0, j, 0)),
                pl.BlockSpec((1, H, tk, hd), lambda b, i, j: (b, 0, j, 0)),
                pl.BlockSpec((tq, C), lambda b, i, j: (b * nq + i, 0)),
                _resident_spec((C, C), lambda b, i, j: (0, 0)),
                pl.BlockSpec((1, C), lambda b, i, j: (0, 0)),
            ],
            out_specs=(
                pl.BlockSpec((tq, C), lambda b, i, j: (b * nq + i, 0)),
                pl.BlockSpec((1, 2, C), lambda b, i, j: (b * nq + i, 0, 0)),
            ),
            scratch_shapes=[
                pltpu.VMEM((H, tq, 1), jnp.float32),       # running max
                pltpu.VMEM((H, tq, 1), jnp.float32),       # running denominator
                pltpu.VMEM((H, tq, hd), jnp.float32),      # running numerator
                pltpu.VMEM((tq, C), jnp.bfloat16),         # head-concat y staging
            ]),
        compiler_params=pltpu.CompilerParams(
            dimension_semantics=("parallel", "parallel", "arbitrary"),
            vmem_limit_bytes=vmem_limit),
    )(q, k, v, x2d, wp, bp)


# --------------------------------------------------------------------------- #
# kernel 3: fused BN-apply + MLP (NewGELU) + residual
# --------------------------------------------------------------------------- #

def _mlp_kernel(x_ref, scale_ref, shift_ref, wfc_ref, bfc_ref, wf2_ref, bf2_ref,
                o_ref):
    x = x_ref[...]
    xn = x * scale_ref[...] + shift_ref[...]               # f32 BN (affine folded)
    h = jnp.dot(xn.astype(jnp.bfloat16), wfc_ref[...],
                preferred_element_type=jnp.float32) + bfc_ref[...]
    h = _new_gelu(h)                                       # f32 elementwise
    m = jnp.dot(h.astype(jnp.bfloat16), wf2_ref[...],
                preferred_element_type=jnp.float32) + bf2_ref[...]
    o_ref[...] = x + m                                     # residual


def _mlp(x2d, scale, shift, wfc, bfc, wf2, bf2, *, vmem_limit):
    n_rows, C = x2d.shape
    C4 = wfc.shape[1]
    tile = _row_tile(n_rows)
    padded = pl.cdiv(n_rows, tile) * tile
    xp = _pad_rows(x2d, padded)
    # TODO(synk): for very large C, tile wfc over N and wf2 over K (with an f32
    # accumulator) instead of keeping full (C,4C)/(4C,C) slabs resident.
    out = pl.pallas_call(
        _mlp_kernel,
        out_shape=jax.ShapeDtypeStruct((padded, C), jnp.float32),
        grid_spec=pltpu.PrefetchScalarGridSpec(
            num_scalar_prefetch=0,
            grid=(padded // tile,),
            in_specs=[
                pl.BlockSpec((tile, C), lambda i: (i, 0)),
                pl.BlockSpec((1, C), lambda i: (0, 0)),
                pl.BlockSpec((1, C), lambda i: (0, 0)),
                _resident_spec((C, C4), lambda i: (0, 0)),
                pl.BlockSpec((1, C4), lambda i: (0, 0)),
                _resident_spec((C4, C), lambda i: (0, 0)),
                pl.BlockSpec((1, C), lambda i: (0, 0)),
            ],
            out_specs=pl.BlockSpec((tile, C), lambda i: (i, 0))),
        compiler_params=pltpu.CompilerParams(
            dimension_semantics=("parallel",),
            vmem_limit_bytes=vmem_limit),
    )(xp, scale, shift, wfc, bfc, wf2, bf2)
    return out[:n_rows] if padded != n_rows else out


# --------------------------------------------------------------------------- #
# wrapper
# --------------------------------------------------------------------------- #

def block_forward(x, params, n_head, *, eps=_EPS):
    B, T, C = x.shape
    assert C % n_head == 0
    assert T % 8 == 0, "T must be 8-aligned"  # TODO(synk): tail-mask ragged T
    n_rows = B * T

    vmem_limit = _vmem_limit_bytes()

    x = x.astype(jnp.float32)
    x2d = x.reshape(n_rows, C)

    # bf16 weights (half the resident VMEM / DMA, 2x MXU rate); f32 biases.
    wqkv = params["wqkv"].astype(jnp.bfloat16)
    bqkv = params["bqkv"].astype(jnp.float32)
    wp = params["wp"].astype(jnp.bfloat16)
    bp = params["bp"].astype(jnp.float32)
    wfc = params["wfc"].astype(jnp.bfloat16)
    bfc = params["bfc"].astype(jnp.float32)
    wf2 = params["wf2"].astype(jnp.bfloat16)
    bf2 = params["bf2"].astype(jnp.float32)

    # BN1 stats (parallel per-tile partials) folded with gamma/beta.
    scale1, shift1 = _bn_scale_shift(x2d, params["g1"], params["b1"],
                                     eps=eps, vmem_limit=vmem_limit)

    # BN1-apply + QKV projection; q/k/v emitted head-major in-kernel.
    q, k, v = _qkv_proj(x, scale1, shift1, wqkv, bqkv, n_head,
                        vmem_limit=vmem_limit)

    # Flash attention + out-projection + residual + BN2 partial stats.
    x1_2d, stats2 = _attention(q, k, v, x2d, wp, bp, vmem_limit=vmem_limit)
    scale2, shift2 = _finish_stats(jnp.sum(stats2, axis=0), n_rows,
                                   params["g2"], params["b2"], eps)

    # BN2-apply + MLP (NewGELU) + residual.
    out2d = _mlp(x1_2d, scale2, shift2, wfc, bfc, wf2, bf2,
                 vmem_limit=vmem_limit)
    return out2d.reshape(B, T, C)


# --------------------------------------------------------------------------- #
# pure-JAX reference (matches the PyTorch module)
# --------------------------------------------------------------------------- #

def block_reference(x, params, n_head):
    B, T, C = x.shape
    hd = C // n_head

    def bn(z2d, g, b, eps=_EPS):
        mean = jnp.mean(z2d, axis=0, keepdims=True)
        var = jnp.mean((z2d - mean) ** 2, axis=0, keepdims=True)
        return (z2d - mean) / jnp.sqrt(var + eps) * g + b

    x2d = x.reshape(B * T, C)
    xn = bn(x2d, params["g1"], params["b1"]).reshape(B, T, C)

    qkv = xn @ params["wqkv"] + params["bqkv"][0]
    q, k, v = jnp.split(qkv, 3, axis=-1)
    q = q.reshape(B, T, n_head, hd).transpose(0, 2, 1, 3)
    k = k.reshape(B, T, n_head, hd).transpose(0, 2, 1, 3)
    v = v.reshape(B, T, n_head, hd).transpose(0, 2, 1, 3)
    att = jnp.einsum("bhtd,bhsd->bhts", q, k) / math.sqrt(hd)
    mask = jnp.tril(jnp.ones((T, T), bool))
    att = jnp.where(mask[None, None], att, -jnp.inf)
    att = jax.nn.softmax(att, axis=-1)
    y = jnp.einsum("bhts,bhsd->bhtd", att, v)
    y = y.transpose(0, 2, 1, 3).reshape(B, T, C)
    y = y @ params["wp"] + params["bp"][0]
    x1 = x + y

    x1n = bn(x1.reshape(B * T, C), params["g2"], params["b2"]).reshape(B, T, C)
    h = x1n @ params["wfc"] + params["bfc"][0]
    h = 0.5 * h * (1.0 + jnp.tanh(math.sqrt(2.0 / math.pi) * (h + 0.044715 * h ** 3)))
    m = h @ params["wf2"] + params["bf2"][0]
    return x1 + m


# --------------------------------------------------------------------------- #
# main
# --------------------------------------------------------------------------- #

if __name__ == "__main__":
    B, T, C, n_head = 2, 8, 32, 4            # block_size = 8, n_embd = 32
    key = jax.random.PRNGKey(0)
    ks = jax.random.split(key, 16)

    def linear_init(kw, kb, fan_in, fan_out):
        bound = 1.0 / math.sqrt(fan_in)
        w = jax.random.uniform(kw, (fan_in, fan_out), jnp.float32, -bound, bound)
        b = jax.random.uniform(kb, (1, fan_out), jnp.float32, -bound, bound)
        return w, b

    wqkv, bqkv = linear_init(ks[0], ks[1], C, 3 * C)
    wp, bp = linear_init(ks[2], ks[3], C, C)
    wfc, bfc = linear_init(ks[4], ks[5], C, 4 * C)
    wf2, bf2 = linear_init(ks[6], ks[7], 4 * C, C)

    params = dict(
        g1=1.0 + 0.1 * jax.random.normal(ks[8], (1, C), jnp.float32),
        b1=0.02 * jax.random.normal(ks[9], (1, C), jnp.float32),
        g2=1.0 + 0.1 * jax.random.normal(ks[10], (1, C), jnp.float32),
        b2=0.02 * jax.random.normal(ks[11], (1, C), jnp.float32),
        wqkv=wqkv, bqkv=bqkv, wp=wp, bp=bp,
        wfc=wfc, bfc=bfc, wf2=wf2, bf2=bf2,
    )

    x = jax.random.normal(ks[12], (B, T, C), jnp.float32)

    out = jax.block_until_ready(block_forward(x, params, n_head))
    ref = block_reference(x, params, n_head)

    assert out.shape == (B, T, C)
    # bf16 matmul inputs with f32 accumulation -> slightly looser tolerance.
    assert jnp.allclose(out, ref, rtol=2e-2, atol=2e-2), (
        f"max abs err {float(jnp.max(jnp.abs(out - ref)))}")

    print("KERNEL_OK")
</pallas_src>

<mosaic_0001>
module attributes {stable_mosaic.version = 11 : i64} {
  func.func @_bn_partial_kernel(%arg0: i32, %arg1: memref<16x32xf32, #tpu.memory_space<vmem>>, %arg2: memref<1x2x32xf32, #tpu.memory_space<vmem>>) attributes {dimension_semantics = [#tpu.dimension_semantics<parallel>], iteration_bounds = array<i64: 1>, scalar_prefetch = 0 : i64, scratch_operands = 0 : i64, tpu.core_type = #tpu.core_type<tc>, window_params = [{transform_indices = @transform_0, window_bounds = array<i64: 16, 32>}, {transform_indices = @transform_1, window_bounds = array<i64: 1, 2, 32>}]} {
    %c0 = arith.constant 0 : index
    %c0_0 = arith.constant 0 : index
    %0 = vector.load %arg1[%c0, %c0_0] : memref<16x32xf32, #tpu.memory_space<vmem>>, vector<16x32xf32>
    %cst = arith.constant dense<0.000000e+00> : vector<32xf32>
    %1 = vector.multi_reduction <add>, %0, %cst [0] : vector<16x32xf32> to vector<32xf32>
    %2 = vector.shape_cast %1 : vector<32xf32> to vector<1x32xf32>
    %c0_1 = arith.constant 0 : index
    %c0_2 = arith.constant 0 : index
    %c0_3 = arith.constant 0 : index
    %3 = vector.load %arg2[%c0_1, %c0_2, %c0_3] : memref<1x2x32xf32, #tpu.memory_space<vmem>>, vector<1x1x32xf32>
    %4 = vector.shape_cast %3 : vector<1x1x32xf32> to vector<1x32xf32>
    %5 = vector.shape_cast %2 : vector<1x32xf32> to vector<1x1x32xf32>
    tpu.vector_store %arg2[%c0_1, %c0_2, %c0_3], %5 {strides = array<i32>} : memref<1x2x32xf32, #tpu.memory_space<vmem>>, vector<1x1x32xf32>,
    %6 = arith.mulf %0, %0 : vector<16x32xf32>
    %cst_4 = arith.constant dense<0.000000e+00> : vector<32xf32>
    %7 = vector.multi_reduction <add>, %6, %cst_4 [0] : vector<16x32xf32> to vector<32xf32>
    %8 = vector.shape_cast %7 : vector<32xf32> to vector<1x32xf32>
    %c0_5 = arith.constant 0 : index
    %c1 = arith.constant 1 : index
    %c0_6 = arith.constant 0 : index
    %9 = vector.load %arg2[%c0_5, %c1, %c0_6] : memref<1x2x32xf32, #tpu.memory_space<vmem>>, vector<1x1x32xf32>
    %10 = vector.shape_cast %9 : vector<1x1x32xf32> to vector<1x32xf32>
    %11 = vector.shape_cast %8 : vector<1x32xf32> to vector<1x1x32xf32>
    tpu.vector_store %arg2[%c0_5, %c1, %c0_6], %11 {strides = array<i32>} : memref<1x2x32xf32, #tpu.memory_space<vmem>>, vector<1x1x32xf32>,
    return
  }
  func.func @transform_0(%arg0: i32) -> (i32, i32) {
    %c0_i32 = arith.constant 0 : i32
    %c0_i32_0 = arith.constant 0 : i32
    return %arg0, %c0_i32 : i32, i32
  }
  func.func @transform_1(%arg0: i32) -> (i32, i32, i32) {
    %c0_i32 = arith.constant 0 : i32
    %c0_i32_0 = arith.constant 0 : i32
    %c0_i32_1 = arith.constant 0 : i32
    return %arg0, %c0_i32, %c0_i32_0 : i32, i32, i32
  }
}

</mosaic_0001>

<bundles_post_ra>
// kernel: tpu_custom_call.1
= control target key start
LH: loop header
LB: loop body
LE: loop exit
PB: predicated region body
PF: predicated region fallthrough
CT: control target
= control target key end

     0   :  { %6 = vsyncpa [#allocation3], 0  ;;  %s154_s0 = inlined_call_operand.hbm [shape: f32[16,32], index: 0, kind: input, shape index: {}]   ;;  %s155_s1 = inlined_call_operand.hbm [shape: f32[1,2,32], index: 1, kind: output, shape index: {}]  }
   0x1   :  { %7 = vsyncpa [#allocation4], 0  ;;  %s116_s6 = smov [#allocation2]   ;;  %s68_s10 = scalar_lea.hbm %s154_s0, 256 }
   0x2   :  { %s13_s7 = sshll.u32 %s116_s6, 4  ;;  %p69_p0 = scmp.ne.s32.totalorder %s154_s0, %s68_s10  ;;  %s14_s7 = int_to_ptr.vmem [resolvable:$true] %s13_s7 }
   0x3   :  { %p72_p1 = scmp.lt.u32.totalorder %s68_s10, %s154_s0 }
   0x5   :  { %p74_p2 = pnand %p72_p1, %p69_p0 }
   0x7   :  { %77 = shalt.err (!%p74_p2)
}
   0x8   :  { %s78_s15 = scalar_lea.vmem %s14_s7, 256  ;;  %p83_p4 = scmp.lt.s32.totalorder %s14_s7, %s14_s7 }
   0x9   :  { %p79_p3 = scmp.ne.s32.totalorder %s14_s7, %s78_s15  ;;  %p84_p5 = scmp.lt.s32.totalorder %s78_s15, %s78_s15 }
   0xb   :  { %p85_p6 = por %p84_p5, %p83_p4 }
   0xd   :  { %p86_p7 = pnand %p85_p6, %p79_p3 }
   0xf   :  { %89 = shalt.err (!%p86_p7)
}
  0x10   :  { %s117_s16 = smov 128   ;;  %s118_s17 = smov 8  }
  0x11   :  { %19 = dma.hbm_to_vmem [thread:$0]  %s154_s0, 256, %s14_s7, [#allocation3], %s117_s16, %s117_s16, %s118_s17  }
  0x12   :  { %112 = dma.done.wait [#allocation3], 256  }
  0x13   :  { %113 = vsyncadd [#allocation3], 4294967040  ;;  %vm25_vm0 = vcmask 261120   ;;  %v23_v0 = vld [vmem:[#allocation2] sm:$0xff]  ;;  %v24_v1 = vld [vmem:[#allocation2 + $0x8] sm:$0xff]  ;;  %vm35_vm1 = vcmask 253952  }
  0x14   :  { %v26_v2 = vsel %vm25_vm0, %v23_v0, 0.0  ;;  %v27_v3 = vsel %vm25_vm0, %v24_v1, 0.0  ;;  %v37_v4 = vmul.f32 %v23_v0, %v23_v0  ;;  %v38_v5 = vmul.f32 %v24_v1, %v24_v1  ;;  %s119_s0 = smov [#allocation5]  }
  0x15   :  { %v28_v6 = vadd.f32 %v27_v3, %v26_v2  ;;  %s55_s20 = sshll.u32 %s119_s0, 4  ;;  %s56_s20 = int_to_ptr.vmem [resolvable:$true] %s55_s20 }
  0x16   :  { %v39_v7 = vsel %vm25_vm0, %v37_v4, 0.0  ;;  %v40_v8 = vsel %vm25_vm0, %v38_v5, 0.0  ;;  %s90_s21 = scalar_lea.vmem %s56_s20, 32  ;;  %p95_p9 = scmp.lt.s32.totalorder %s56_s20, %s56_s20 }
  0x17   :  { %v29_v9 = vrot.slane %v28_v6, 4  ;;  %v41_v10 = vadd.f32 %v40_v8, %v39_v7  ;;  %p91_p8 = scmp.ne.s32.totalorder %s56_s20, %s90_s21  ;;  %p96_p10 = scmp.lt.s32.totalorder %s90_s21, %s90_s21 }
  0x19   :  { %v30_v11 = vadd.f32 %v29_v9, %v28_v6  ;;  %v42_v12 = vrot.slane %v41_v10, 4  ;;  %p97_p11 = por %p96_p10, %p95_p9 }
  0x1b   :  { %v31_v13 = vrot.slane %v30_v11, 2  ;;  %v43_v14 = vadd.f32 %v42_v12, %v41_v10  ;;  %p98_p12 = pnand %p97_p11, %p91_p8 }
  0x1d   :  { %v32_v15 = vadd.f32 %v31_v13, %v30_v11  ;;  %v44_v16 = vrot.slane %v43_v14, 2 }
  0x1f   :  { %v33_v17 = vrot.slane %v32_v15, 1  ;;  %v45_v18 = vadd.f32 %v44_v16, %v43_v14 }
  0x21   :  { %v34_v19 = vadd.f32 %v33_v17, %v32_v15  ;;  %v46_v20 = vrot.slane %v45_v18, 1 }
  0x23   :  { %36 = vst.msk [vmem:[#allocation5] sm:$0x1] %vm35_vm1, %v34_v19  ;;  %v47_v21 = vadd.f32 %v46_v20, %v45_v18 }
  0x25   :  { %48 = vst.msk [vmem:[#allocation5 + $0x1] sm:$0x1] %vm35_vm1, %v47_v21 }
  0x26   :  { %101 = shalt.err (!%p98_p12)
}
  0x27   :  { %s102_s24 = scalar_lea.hbm %s155_s1, 32 }
  0x28   :  { %p103_p13 = scmp.ne.s32.totalorder %s155_s1, %s102_s24  ;;  %p106_p0 = scmp.lt.u32.totalorder %s102_s24, %s155_s1 }
  0x2a   :  { %p108_p1 = pnand %p106_p0, %p103_p13 }
  0x2c   :  { %111 = shalt.err (!%p108_p1)
}
  0x2d   :  { %58 = dma.vmem_to_hbm [thread:$0]  %s56_s20, 32, %s155_s1, [#allocation4]  }
  0x2e   :  { %114 = dma.done.wait [#allocation4], 32  }
  0x2f   :  { %115 = vsyncadd [#allocation4], 4294967264 }
  0x30   :  { %62 = vsyncpa [#allocation3], 1 }
  0x31   :  { %63 = vsyncpa [#allocation4], 1 }

</bundles_post_ra>
